<compile_context>
chip_gen: v7x
topology: tpu7x:2x2x1
jax: 0.10.0
libtpu: 0.0.40
codegen_flags: <defaults>
</compile_context>

<pallas_src>
import jax
import jax.numpy as jnp
from jax.experimental import pallas as pl
from jax.experimental.pallas import tpu as pltpu


def _round_up(x: int, m: int) -> int:
    return ((x + m - 1) // m) * m


def _make_direct_kernel(G, ch, cw, top, left, num_blocks, rem):
    """Wide-crop path: crop folded entirely into the read DMA -> output block."""
    def kernel(x_hbm, o_ref, sem):
        i = pl.program_id(0)
        base = i * G

        def do_copy(n):
            cp = pltpu.make_async_copy(
                x_hbm.at[pl.ds(base, n), pl.ds(top, ch), pl.ds(left, cw)],
                o_ref.at[pl.ds(0, n)],
                sem)
            cp.start()
            cp.wait()

        if rem == 0:
            do_copy(G)
        else:
            @pl.when(i < num_blocks - 1)
            def _():
                do_copy(G)

            @pl.when(i == num_blocks - 1)
            def _():
                do_copy(rem)

    return kernel


def _make_slab_kernel(G, ch, cw, W, top, left, num_blocks, rem):
    """Narrow-crop path: row-contiguous slab read (H crop in DMA), lane crop in-kernel."""
    def kernel(x_hbm, o_ref, slab_ref, sem):
        i = pl.program_id(0)
        base = i * G

        def fetch(n):
            cp = pltpu.make_async_copy(
                x_hbm.at[pl.ds(base, n), pl.ds(top, ch), :],
                slab_ref.at[pl.ds(0, n)],
                sem)
            cp.start()
            cp.wait()

        if rem == 0:
            fetch(G)
        else:
            @pl.when(i < num_blocks - 1)
            def _():
                fetch(G)

            @pl.when(i == num_blocks - 1)
            def _():
                fetch(rem)

        # Lane (W) crop: cheap VMEM->vreg->VMEM shift, hidden under the HBM DMAs.
        # Stale rows beyond the ragged tail land in the dropped padded region
        # of the output block.
        o_ref[...] = slab_ref[:, :, left:left + cw]

    return kernel


def center_crop(x: jax.Array, size) -> jax.Array:
    """Center-crop the last two dims of an NCHW array (torchvision convention)."""
    B, C, H, W = x.shape
    if isinstance(size, (tuple, list)):
        ch, cw = int(size[0]), int(size[1])
    else:
        ch = cw = int(size)
    assert 1 <= ch <= H and 1 <= cw <= W, "crop must fit inside the image"

    # torchvision offset convention.
    top = int(round((H - ch) / 2.0))
    left = int(round((W - cw) / 2.0))

    BC = B * C
    x2 = x.reshape(BC, H, W)
    itemsize = jnp.dtype(x.dtype).itemsize

    # Path selection: slab read when the in-DMA-cropped runs would be tiny, or
    # when the crop covers most of the width (over-read is then small anyway).
    use_slab = (cw * itemsize < 1024) or (2 * cw > W)

    # Dtype-aware padded VMEM footprint per image (sublane x lane padding).
    sub = max(8, 32 // itemsize)            # f32: 8, bf16: 16, int8/fp8: 32
    pad_out = _round_up(ch, sub) * _round_up(cw, 128) * itemsize
    pad_slab = _round_up(ch, sub) * _round_up(W, 128) * itemsize
    per_img = 2 * pad_out + (pad_slab if use_slab else 0)   # 2x: output double-buffered

    budget = 16 * 1024 * 1024               # per-step target; 2x headroom vs limit
    g_budget = max(1, budget // per_img)
    g_cap = max(1, BC // 4)                 # >=4 steps -> >=2 per TC on v7x megacore
    G = int(max(1, min(g_budget, g_cap)))
    num_blocks = (BC + G - 1) // G
    rem = BC % G

    if use_slab:
        kernel = _make_slab_kernel(G, ch, cw, W, top, left, num_blocks, rem)
        scratch_shapes = [pltpu.VMEM((G, ch, W), x.dtype),
                          pltpu.SemaphoreType.DMA(())]
        bytes_read = BC * ch * W * itemsize
    else:
        kernel = _make_direct_kernel(G, ch, cw, top, left, num_blocks, rem)
        scratch_shapes = [pltpu.SemaphoreType.DMA(())]
        bytes_read = BC * ch * cw * itemsize
    bytes_accessed = bytes_read + BC * ch * cw * itemsize

    out2 = pl.pallas_call(
        kernel,
        out_shape=jax.ShapeDtypeStruct((BC, ch, cw), x.dtype),
        grid_spec=pltpu.PrefetchScalarGridSpec(
            num_scalar_prefetch=0,
            grid=(num_blocks,),
            # Input stays in HBM; crop is done by manual DMA, no auto-tiling.
            in_specs=[pl.BlockSpec(memory_space=pl.ANY)],
            # Last two block dims equal full output dims -> (8,128) rule ok.
            out_specs=pl.BlockSpec((G, ch, cw), lambda i: (i, 0, 0)),
            scratch_shapes=scratch_shapes),
        compiler_params=pltpu.CompilerParams(
            dimension_semantics=("parallel",),
            vmem_limit_bytes=32 * 1024 * 1024),
        cost_estimate=pl.CostEstimate(
            flops=0, transcendentals=0, bytes_accessed=bytes_accessed),
    )(x2)

    return out2.reshape(B, C, ch, cw)


class CenterCrop:
    """JAX/Pallas mirror of the PyTorch CenterCrop module (no parameters)."""

    def __init__(self, size):
        self.size = size

    def __call__(self, x: jax.Array) -> jax.Array:
        return center_crop(x, self.size)


def _check(key, B, C, H, W, size):
    x = jax.random.normal(key, (B, C, H, W), dtype=jnp.float32)
    out = jax.block_until_ready(CenterCrop(size)(x))

    if isinstance(size, (tuple, list)):
        ch, cw = int(size[0]), int(size[1])
    else:
        ch = cw = int(size)
    top = int(round((H - ch) / 2.0))
    left = int(round((W - cw) / 2.0))
    ref = x[:, :, top:top + ch, left:left + cw]

    assert out.shape == (B, C, ch, cw), out.shape
    assert out.dtype == x.dtype
    assert bool(jnp.array_equal(out, ref))


if __name__ == "__main__":
    key = jax.random.PRNGKey(0)
    k1, k2, k3 = jax.random.split(key, 3)

    # Slab path, divisible grid (BC=8, G=2, 4 steps).
    _check(k1, 2, 4, 16, 16, 8)
    # Slab path, ragged tail + rectangular crop (BC=9, G=2, 5 steps, rem=1).
    _check(k2, 3, 3, 16, 16, (8, 12))
    # Direct (in-DMA crop) path, ragged tail (wide crop: cw*itemsize >= 1 KiB).
    _check(k3, 3, 3, 8, 512, (8, 256))

    print("KERNEL_OK")
</pallas_src>

<mosaic_0001>
module attributes {stable_mosaic.version = 11 : i64} {
  func.func @kernel(%arg0: i32, %arg1: memref<8x16x16xf32, #tpu.memory_space<any>>, %arg2: memref<2x8x8xf32, #tpu.memory_space<vmem>>, %arg3: memref<2x8x16xf32, #tpu.memory_space<vmem>>, %arg4: memref<!tpu.dma_semaphore, #tpu.memory_space<semaphore_mem>>) attributes {dimension_semantics = [#tpu.dimension_semantics<parallel>], iteration_bounds = array<i64: 4>, scalar_prefetch = 0 : i64, scratch_operands = 2 : i64, tpu.core_type = #tpu.core_type<tc>, window_params = [{}, {transform_indices = @transform_1, window_bounds = array<i64: 2, 8, 8>}]} {
    %c2_i32 = arith.constant 2 : i32
    %0 = arith.muli %arg0, %c2_i32 : i32
    %c4_i32 = arith.constant 4 : i32
    %c0_i32 = arith.constant 0 : i32
    %1 = tpu.memref_slice %arg1[%0, %c4_i32, %c0_i32] : memref<8x16x16xf32, #tpu.memory_space<any>> -> memref<2x8x16xf32, #tpu.memory_space<any>>
    %c0_i32_0 = arith.constant 0 : i32
    %c0_i32_1 = arith.constant 0 : i32
    %c0_i32_2 = arith.constant 0 : i32
    %2 = tpu.memref_slice %arg3[%c0_i32_0, %c0_i32_1, %c0_i32_2] : memref<2x8x16xf32, #tpu.memory_space<vmem>> -> memref<2x8x16xf32, #tpu.memory_space<vmem>>
    tpu.enqueue_dma source(%1 : memref<2x8x16xf32, #tpu.memory_space<any>>) target(%2 : memref<2x8x16xf32, #tpu.memory_space<vmem>>) target_semaphore(%arg4 : memref<!tpu.dma_semaphore, #tpu.memory_space<semaphore_mem>>)
    %c4_i32_3 = arith.constant 4 : i32
    %c0_i32_4 = arith.constant 0 : i32
    %3 = tpu.memref_slice %arg1[%0, %c4_i32_3, %c0_i32_4] : memref<8x16x16xf32, #tpu.memory_space<any>> -> memref<2x8x16xf32, #tpu.memory_space<any>>
    %c0_i32_5 = arith.constant 0 : i32
    %c0_i32_6 = arith.constant 0 : i32
    %c0_i32_7 = arith.constant 0 : i32
    %4 = tpu.memref_slice %arg3[%c0_i32_5, %c0_i32_6, %c0_i32_7] : memref<2x8x16xf32, #tpu.memory_space<vmem>> -> memref<2x8x16xf32, #tpu.memory_space<vmem>>
    tpu.wait_dma2 semaphore(%arg4 : memref<!tpu.dma_semaphore, #tpu.memory_space<semaphore_mem>>) src(%3 : memref<2x8x16xf32, #tpu.memory_space<any>>) dst(%4 : memref<2x8x16xf32, #tpu.memory_space<vmem>>)
    %c0 = arith.constant 0 : index
    %c0_8 = arith.constant 0 : index
    %c4 = arith.constant 4 : index
    %5 = vector.load %arg3[%c0, %c0_8, %c4] : memref<2x8x16xf32, #tpu.memory_space<vmem>>, vector<2x8x8xf32>
    %c0_9 = arith.constant 0 : index
    %c0_10 = arith.constant 0 : index
    %c0_11 = arith.constant 0 : index
    %6 = vector.load %arg2[%c0_9, %c0_10, %c0_11] : memref<2x8x8xf32, #tpu.memory_space<vmem>>, vector<2x8x8xf32>
    tpu.vector_store %arg2[%c0_9, %c0_10, %c0_11], %5 {strides = array<i32>} : memref<2x8x8xf32, #tpu.memory_space<vmem>>, vector<2x8x8xf32>,
    return
  }
  func.func @transform_1(%arg0: i32) -> (i32, i32, i32) {
    %c0_i32 = arith.constant 0 : i32
    %c0_i32_0 = arith.constant 0 : i32
    %c0_i32_1 = arith.constant 0 : i32
    return %arg0, %c0_i32, %c0_i32_0 : i32, i32, i32
  }
}

</mosaic_0001>

<bundles_post_ra>
// kernel: tpu_custom_call.1
= control target key start
LH: loop header
LB: loop body
LE: loop exit
PB: predicated region body
PF: predicated region fallthrough
CT: control target
= control target key end

     0   :  { %6 = vsyncpa [#allocation5], 0  ;;  %s400_s0 = inlined_call_operand.hbm [shape: f32[8,16,16], index: 0, kind: input, shape index: {}]   ;;  %s401_s1 = inlined_call_operand.hbm [shape: f32[8,8,8], index: 1, kind: output, shape index: {}]  }
   0x1   :  { %8 = vsyncpa [#allocation5 + $0x1], 0  ;;  %s294_s6 = smov 0   ;;  %s296_s7 = smov 0  }
   0x2   :  { %s298_s8 = smov 0  }
   0x3 LB: > { %s145_s9 = sadd.s32 4294967295, %s276_s8   ;;  %s311_s10 = sadd.s32 1, %s276_s8   ;;  %s276_s8 = sphi %s298_s8, %s406_s8   ;;  %s272_s7 = sphi %s296_s7, %s405_s7   ;;  %s268_s6 = sphi %s294_s6, %s404_s6  }
   0x4   : > { %s17_s11 = ssub.s32 %s276_s8, %s311_s10  ;;  %s20_s12 = sadd.s32 1, %s272_s7 }
   0x5   : > { %p18_p0 = scmp.eq.s32.totalorder %s17_s11, 0  ;;  %p146_p1 = scmp.ne.s32.totalorder %s17_s11, 0 }
   0x6   : > { %p24_p2 = scmp.eq.s32.totalorder %s276_s8, 3  ;;  %p29_p3 = scmp.ne.s32.totalorder %s272_s7, %s268_s6 }
   0x7   : > { %s320_s13 = scalar_select %p18_p0, %s272_s7, %s20_s12  }
   0x8   : > { %p322_p4 = por %p146_p1, %p24_p2  ;;  %p30_p5 = scmp.eq.s32.totalorder %s145_s9, 3 }
   0x9   : > { %p147_p7 = scmp.ge.s32.totalorder %s276_s8, 4 }
   0xa   : > { %p326_p6 = por %p30_p5, %p29_p3  ;;  %s44_s16 = sand.u32 (!%p147_p7), 1, %s272_s7  }
   0xb   : > { %39 = sbr.rel (%p147_p7) target bundleno = 171 (0xab), region = 12  ;;  %s157_s17 = sshll.u32 (!%p147_p7), %s276_s8, 9 }
   0xc   : > { %s335_s18 = sshll.u32 (!%p147_p7), %s44_s16, 4  ;;  %s124_s21 = scalar_lea.hbm (!%p147_p7), %s400_s0, %s157_s17 }
   0xd   : > { %s125_s22 = scalar_lea.hbm (!%p147_p7), %s124_s21, 64  ;;  %s278_s23 = smov (!%p147_p7), [#allocation2]  }
   0xe   : > { %s54_s24 = sshll.u32 (!%p147_p7), %s278_s23, 4  ;;  %s219_s25 = scalar_lea.hbm (!%p147_p7), %s124_s21, 320  ;;  %s55_s24 = int_to_ptr.vmem [resolvable:$true] %s54_s24 }
   0xf   : > { %p196_p8 = scmp.ne.s32.totalorder (!%p147_p7), %s125_s22, %s219_s25  ;;  %s197_s28 = scalar_lea.hbm (!%p147_p7), %s400_s0, 2048 }
  0x10   : > { %p198_p9 = scmp.lt.u32.totalorder (!%p147_p7), %s125_s22, %s400_s0  ;;  %p199_p10 = scmp.lt.u32.totalorder (!%p147_p7), %s197_s28, %s219_s25 }
  0x11   : > { %p201_p12 = scmp.lt.u32.totalorder (!%p147_p7), %s219_s25, %s125_s22 }
  0x12   : > { %p200_p11 = por %p199_p10, %p198_p9 }
  0x14   : > { %p202_p13 = por %p201_p12, %p200_p11 }
  0x16   : > { %p203_p0 = pnand %p202_p13, %p196_p8 }
  0x18   : > { %206 = shalt.err (!%p203_p0)  }
  0x19   : > { %s207_s2 = scalar_lea.vmem %s55_s24, 256  ;;  %p212_p2 = scmp.lt.s32.totalorder %s55_s24, %s55_s24 }
  0x1a   : > { %p208_p1 = scmp.ne.s32.totalorder %s55_s24, %s207_s2  ;;  %p213_p3 = scmp.lt.s32.totalorder %s207_s2, %s207_s2 }
  0x1c   : > { %p214_p5 = por %p213_p3, %p212_p2 }
  0x1e   : > { %p215_p7 = pnand %p214_p5, %p208_p1 }
  0x20   : > { %218 = shalt.err (!%p215_p7)  }
  0x21   : > { %s279_s3 = smov 256   ;;  %s280_s4 = smov 128  }
  0x22   : > { %s281_s5 = smov 8   ;;  %s46_s9 = scalar_lea.vmem [#allocation4], %s335_s18 }
  0x23   : > { %57 = dma.hbm_to_vmem [thread:$0]  %s125_s22, 256, %s55_s24, [#allocation3], %s279_s3, %s280_s4, %s281_s5 }
  0x24   : > { %260 = dma.done.wait [#allocation3], 256 }
  0x25   : > { %261 = vsyncadd [#allocation3], 4294967040  ;;  %v62_v0 = vld [vmem:[#allocation2] sm:$0xff]  ;;  %s282_s11 = smov 124   ;;  %v63_v1 = vld [vmem:[#allocation2 + $0x8] sm:$0xff]  ;;  %vm72_vm0 = vcmask 64512  }
  0x26   : > { %66 = vrot.lane.b32.xlu0 %v62_v0, %s282_s11  ;;  %s158_s12 = sshll.u32 %s276_s8, 8  ;;  %s89_s17 = sshll.u32 %s46_s9, 4  ;;  %s355_s17 = int_to_ptr.vmem [resolvable:$true] %s89_s17 }
  0x27   : > { %s353_s21 = scalar_lea.hbm %s401_s1, %s158_s12  ;;  %s359_s18 = scalar_lea.sflag [#allocation5], %s44_s16 }
  0x28   : > { %s220_s22 = scalar_lea.vmem %s355_s17, 256  ;;  %s283_s23 = smov [#allocation4]  }
  0x29   : > { %p221_p8 = scmp.ne.s32.totalorder %s355_s17, %s220_s22  ;;  %s224_s24 = sshll.u32 %s283_s23, 4  ;;  %s225_s24 = int_to_ptr.vmem [resolvable:$false] %s224_s24 }
  0x2a   : > { %68 = vrot.lane.b32.xlu0 %v63_v1, %s282_s11  ;;  %s226_s25 = scalar_lea.vmem %s225_s24, 512  ;;  %p227_p11 = scmp.lt.s32.totalorder %s355_s17, %s225_s24 }
  0x2b   : > { %p222_p9 = pnand %p221_p8, %p322_p4  ;;  %p228_p12 = scmp.lt.s32.totalorder %s226_s25, %s220_s22 }
  0x2d   : > { %p223_p10 = pneg %p222_p9  ;;  %p229_p13 = por %p228_p12, %p227_p11 }
  0x2f   : > { %p230_p0 = pnand %p229_p13, %p223_p10 }
  0x98   : > { %v67_v2 = vpop.permute.xlu0 %66 }
  0x99   : > { %73 = vst.msk [vmem:[%s46_s9] sm:$0xff] %vm72_vm0, %v67_v2 }
  0x9c   : > { %v69_v3 = vpop.permute.xlu0 %68 }
  0x9d   : > { %74 = vst.msk [vmem:[%s46_s9 + $0x8] sm:$0xff] %vm72_vm0, %v69_v3 }
  0x9e   : > { %233 = shalt.err (!%p230_p0)
}
  0x9f   : > { %s234_s16 = scalar_lea.hbm %s353_s21, 256  ;;  %s238_s28 = scalar_lea.hbm %s401_s1, 1024 }
  0xa0   : > { %p235_p1 = scmp.ne.s32.totalorder %s353_s21, %s234_s16  ;;  %p239_p5 = scmp.lt.u32.totalorder %s353_s21, %s401_s1 }
  0xa1   : > { %p240_p7 = scmp.lt.u32.totalorder %s238_s28, %s234_s16  ;;  %p242_p9 = scmp.lt.u32.totalorder %s234_s16, %s353_s21 }
  0xa2   : > { %p236_p2 = pnand %p235_p1, %p322_p4 }
  0xa3   : > { %p241_p8 = por %p240_p7, %p239_p5 }
  0xa4   : > { %p237_p3 = pneg %p236_p2 }
  0xa5   : > { %p243_p10 = por %p242_p9, %p241_p8 }
  0xa7   : > { %p244_p11 = pnand %p243_p10, %p237_p3 }
  0xa9   : > { %247 = shalt.err (!%p244_p11)
}
  0xaa   : > { %159 = dma.vmem_to_hbm [thread:$0]  (%p322_p4), %s355_s17, 256, %s353_s21, %s359_s18, %s280_s4, %s280_s4, %s281_s5  }
  0xab PF: > { %p165_p12 = scmp.ge.s32.totalorder %s276_s8, 1  ;;  %s104_s2 = sand.u32 1, %s268_s6  }
  0xac   : > { %s105_s3 = scalar_lea.sflag [#allocation5], %s104_s2 }
  0xad   : > { %p162_p13 = pnand %p165_p12, %p326_p6 }
  0xaf   : > { %263 = dma.done.wait (!%p162_p13), %s105_s3, 256  }
  0xb0   : > { %265 = vsyncadd (!%p162_p13), %s105_s3, 4294967040  ;;  %p11_p0 = scmp.ge.s32.totalorder %s311_s10, 5   ;;  %s404_s6 = smov %s272_s7 }
  0xb1   : > { %s405_s7 = smov %s320_s13  ;;  %s406_s8 = smov %s311_s10 }
  0xb2   :  { %13 = sbr.rel (!%p11_p0) target bundleno = 3 (0x3), region = 45 }
  0xb9   :  { %110 = vsyncpa [#allocation5], 1 }
  0xba   :  { %112 = vsyncpa [#allocation5 + $0x1], 1 }
  0xbb   :  { %113 = vsyncmov [#allocation3] }
  0xbe   :  { %s114_s8 = vpop.sfrf %113 }
  0xbf   :  { %p156_p4 = scmp.ne.s32.totalorder %s114_s8, 0 }
  0xc1   :  { %118 = shalt.err (%p156_p4)  }

</bundles_post_ra>
